<compile_context>
chip_gen: v5e
topology: v5e:2x2
jax: 0.10.0
libtpu: 0.0.40
codegen_flags: <defaults>
</compile_context>

<pallas_src>
import math

import jax
import jax.numpy as jnp
import numpy as np
from jax import lax
from jax.experimental import pallas as pl
from jax.experimental.pallas import tpu as pltpu

_INV_SQRT2 = 1.0 / math.sqrt(2.0)
_SQRT_2_OVER_PI = math.sqrt(2.0 / math.pi)


def _gelu(x, approximate=False):
    if approximate:
        # tanh approximation (EUP slot); NOT bit-identical to torch.nn.GELU() default
        return 0.5 * x * (1.0 + jnp.tanh(_SQRT_2_OVER_PI * (x + 0.044715 * x * x * x)))
    # exact (erf-based) GELU, matching torch.nn.GELU() default
    return 0.5 * x * (1.0 + lax.erf(x * _INV_SQRT2))


# ---------------------------------------------------------------------------
# Kernels
# ---------------------------------------------------------------------------

def _make_small_kernel(nb, approximate_gelu):
    def kernel(x_ref, w1_ref, b_ref, o_ref):
        # x_ref: (nb, Cin, L)  w1_ref: (Cout, Cin)  b_ref: (Cout, 1)  o_ref: (nb, Cout, L)
        w1 = w1_ref[...]
        b1 = b_ref[...]                                       # f32, BN folded in
        for b in range(nb):
            h = jnp.dot(w1, x_ref[b], preferred_element_type=jnp.float32)
            o_ref[b] = _gelu(h + b1, approximate_gelu).astype(o_ref.dtype)
    return kernel


def _make_full_kernel(nb, compute_dtype, approximate_gelu):
    def kernel(x_ref, w1_ref, w2_ref, b_ref, o_ref):
        # x_ref: (nb, Cin, L)   w1_ref: (Cout, Cin)   w2_ref: (3, Cout, Cout)
        # b_ref: (Cout, 2)      o_ref: (nb, Cout, L)
        L = x_ref.shape[-1]
        w1 = w1_ref[...]
        w_left, w_center, w_right = w2_ref[0], w2_ref[1], w2_ref[2]
        b1 = b_ref[:, 0:1]
        b2 = b_ref[:, 1:2]

        # Boundary masks for the k=3 / pad=1 conv, built in-kernel (VALU/XLU slack).
        lane = lax.broadcasted_iota(jnp.int32, (1, L), 1)
        not_first = (lane != 0).astype(jnp.float32)           # 0 at l == 0
        not_last = (lane != L - 1).astype(jnp.float32)        # 0 at l == L-1

        for b in range(nb):
            # Stage 1: Conv1d(k=1) (+ folded BN) + GELU
            h = jnp.dot(w1, x_ref[b], preferred_element_type=jnp.float32)
            h = _gelu(h + b1, approximate_gelu)
            hc = h.astype(compute_dtype)                      # intentional inter-stage cast

            # Stage 2: Conv1d(k=3, pad=1) (+ folded BN) as 3 accumulating MXU dots
            # (no h3 concat materialization).
            h_prev = (pltpu.roll(hc, shift=1, axis=1) * not_first).astype(compute_dtype)
            h_next = (pltpu.roll(hc, shift=L - 1, axis=1) * not_last).astype(compute_dtype)
            y = jnp.dot(w_center, hc, preferred_element_type=jnp.float32)
            y = y + jnp.dot(w_left, h_prev, preferred_element_type=jnp.float32)
            y = y + jnp.dot(w_right, h_next, preferred_element_type=jnp.float32)
            o_ref[b] = _gelu(y + b2, approximate_gelu).astype(o_ref.dtype)
    return kernel


# ---------------------------------------------------------------------------
# Wrapper
# ---------------------------------------------------------------------------

def _fold_bn_into_conv(w, b, gamma, beta, mean, var, eps=1e-5):
    """Fold inference-mode BatchNorm1d into the preceding conv's weight/bias."""
    scale = gamma / jnp.sqrt(var + eps)
    if w.ndim == 2:
        w_f = w * scale[:, None]
    else:  # (Cout, Cin, K)
        w_f = w * scale[:, None, None]
    b_f = scale * b + (beta - mean * scale)
    return w_f, b_f


def _pick_nb(N, Cin, Cout, L, in_bytes, out_bytes, vmem_budget_bytes):
    # per-batch-element VMEM: double-buffered x/out tiles + ~4 f32 (Cout, L) temps
    per_b = 2 * (Cin * L * in_bytes + Cout * L * out_bytes) + 4 * Cout * L * 4
    nb = max(1, min(N, 8, vmem_budget_bytes // max(per_b, 1)))
    if N >= 2:
        nb = min(nb, pl.cdiv(N, 2))  # >= 2 grid steps so both v7x TensorCores get work
    return int(nb)


def conv_block(x, params, *, small, compute_dtype=jnp.float32,
               approximate_gelu=False, vmem_budget_bytes=8 << 20):
    """x: (N, Cin, L); params: dict of ConvBlock parameters (inference-mode BN only)."""
    N, Cin, L = x.shape
    Cout = params["w1"].shape[0]
    out_dtype = x.dtype
    in_bytes = jnp.dtype(compute_dtype).itemsize
    out_bytes = jnp.dtype(out_dtype).itemsize

    nb = _pick_nb(N, Cin, Cout, L, in_bytes, out_bytes, vmem_budget_bytes)
    n_blocks = pl.cdiv(N, nb)
    # TODO(synk): for very long L a single (C, L) per-batch tile can exceed scoped VMEM
    # (esp. v7x ~32 MiB); add an L-blocking grid axis with a 1-column halo (pl.Element /
    # manual DMA) instead of batch-only blocking.

    # --- fold BN1 into conv1 ---
    w1f, b1f = _fold_bn_into_conv(
        params["w1"].astype(jnp.float32), params["b1"].astype(jnp.float32),
        params["bn1_gamma"], params["bn1_beta"], params["bn1_mean"], params["bn1_var"])

    # x stays in its native (N, Cin, L) layout; only cast if the compute dtype differs.
    xk = x if x.dtype == compute_dtype else x.astype(compute_dtype)

    x_spec = pl.BlockSpec((nb, Cin, L), lambda i: (i, 0, 0))
    o_spec = pl.BlockSpec((nb, Cout, L), lambda i: (i, 0, 0))
    w1_spec = pl.BlockSpec((Cout, Cin), lambda i: (0, 0))

    flops = 2 * N * L * Cout * Cin
    trans = N * Cout * L
    bytes_accessed = N * L * (Cin * in_bytes + Cout * out_bytes) + Cout * Cin * in_bytes

    if small:
        args = (xk, w1f.astype(compute_dtype), b1f.reshape(Cout, 1))
        in_specs = [x_spec, w1_spec, pl.BlockSpec((Cout, 1), lambda i: (0, 0))]
        kernel = _make_small_kernel(nb, approximate_gelu)
    else:
        # --- fold BN2 into conv2; pack the 3 taps as (3, Cout, Cout) [left|center|right] ---
        w2f, b2f = _fold_bn_into_conv(
            params["w2"].astype(jnp.float32), params["b2"].astype(jnp.float32),
            params["bn2_gamma"], params["bn2_beta"], params["bn2_mean"], params["bn2_var"])
        w2p = jnp.moveaxis(w2f, 2, 0)            # (3, Cout, Cout)
        b_pack = jnp.stack([b1f, b2f], axis=1)   # (Cout, 2), f32
        args = (xk, w1f.astype(compute_dtype), w2p.astype(compute_dtype), b_pack)
        in_specs = [x_spec, w1_spec,
                    pl.BlockSpec((3, Cout, Cout), lambda i: (0, 0, 0)),
                    pl.BlockSpec((Cout, 2), lambda i: (0, 0))]
        kernel = _make_full_kernel(nb, compute_dtype, approximate_gelu)
        flops += 2 * N * L * 3 * Cout * Cout
        trans += N * Cout * L
        bytes_accessed += 3 * Cout * Cout * in_bytes

    return pl.pallas_call(
        kernel,
        out_shape=jax.ShapeDtypeStruct((N, Cout, L), out_dtype),
        grid_spec=pltpu.PrefetchScalarGridSpec(
            num_scalar_prefetch=0,
            grid=(n_blocks,),
            in_specs=in_specs,
            out_specs=o_spec,
        ),
        compiler_params=pltpu.CompilerParams(dimension_semantics=("parallel",)),
        cost_estimate=pl.CostEstimate(flops=int(flops), transcendentals=int(trans),
                                      bytes_accessed=int(bytes_accessed)),
    )(*args)


# ---------------------------------------------------------------------------
# Pure-JAX reference (for correctness check)
# ---------------------------------------------------------------------------

def _bn_scale_shift(gamma, beta, mean, var, eps=1e-5):
    scale = gamma / jnp.sqrt(var + eps)
    return scale, beta - mean * scale


def conv_block_ref(x, params, *, small):
    s1, t1 = _bn_scale_shift(params["bn1_gamma"], params["bn1_beta"],
                             params["bn1_mean"], params["bn1_var"])
    h = jnp.einsum("oc,ncl->nol", params["w1"], x) + params["b1"][None, :, None]
    h = h * s1[None, :, None] + t1[None, :, None]
    h = _gelu(h)
    if small:
        return h
    s2, t2 = _bn_scale_shift(params["bn2_gamma"], params["bn2_beta"],
                             params["bn2_mean"], params["bn2_var"])
    L = x.shape[2]
    hp = jnp.pad(h, ((0, 0), (0, 0), (1, 1)))
    y = sum(jnp.einsum("oc,ncl->nol", params["w2"][:, :, t], hp[:, :, t:t + L])
            for t in range(3))
    y = y + params["b2"][None, :, None]
    y = y * s2[None, :, None] + t2[None, :, None]
    return _gelu(y)


# ---------------------------------------------------------------------------
# Main
# ---------------------------------------------------------------------------

if __name__ == "__main__":
    key = jax.random.PRNGKey(0)
    N, Cin, Cout, L = 2, 4, 8, 128

    keys = jax.random.split(key, 12)
    params = {
        "w1": 0.1 * jax.random.normal(keys[0], (Cout, Cin), jnp.float32),
        "b1": 0.1 * jax.random.normal(keys[1], (Cout,), jnp.float32),
        "bn1_gamma": 1.0 + 0.1 * jax.random.normal(keys[2], (Cout,), jnp.float32),
        "bn1_beta": 0.1 * jax.random.normal(keys[3], (Cout,), jnp.float32),
        "bn1_mean": 0.05 * jax.random.normal(keys[4], (Cout,), jnp.float32),
        "bn1_var": 1.0 + 0.1 * jnp.abs(jax.random.normal(keys[5], (Cout,), jnp.float32)),
        "w2": 0.1 * jax.random.normal(keys[6], (Cout, Cout, 3), jnp.float32),
        "b2": 0.1 * jax.random.normal(keys[7], (Cout,), jnp.float32),
        "bn2_gamma": 1.0 + 0.1 * jax.random.normal(keys[8], (Cout,), jnp.float32),
        "bn2_beta": 0.1 * jax.random.normal(keys[9], (Cout,), jnp.float32),
        "bn2_mean": 0.05 * jax.random.normal(keys[10], (Cout,), jnp.float32),
        "bn2_var": 1.0 + 0.1 * jnp.abs(jax.random.normal(keys[11], (Cout,), jnp.float32)),
    }
    x = jax.random.normal(jax.random.PRNGKey(1), (N, Cin, L), jnp.float32)

    # full path (Conv1d k=1 -> BN -> GELU -> Conv1d k=3 -> BN -> GELU), f32 matmuls
    out_full = jax.block_until_ready(conv_block(x, params, small=False))
    ref_full = conv_block_ref(x, params, small=False)
    np.testing.assert_allclose(np.asarray(out_full), np.asarray(ref_full),
                               rtol=1e-4, atol=1e-5)

    # small path (Conv1d k=1 -> BN -> GELU), f32 matmuls
    out_small = jax.block_until_ready(conv_block(x, params, small=True))
    ref_small = conv_block_ref(x, params, small=True)
    np.testing.assert_allclose(np.asarray(out_small), np.asarray(ref_small),
                               rtol=1e-4, atol=1e-5)

    # full path with bf16 matmul operands (f32 accumulation / f32 elementwise);
    # useful on v5e/v6e/v7x alike since the kernel is HBM-bound.
    out_bf16 = jax.block_until_ready(
        conv_block(x, params, small=False, compute_dtype=jnp.bfloat16))
    np.testing.assert_allclose(np.asarray(out_bf16), np.asarray(ref_full),
                               rtol=2e-2, atol=2e-2)

    print("KERNEL_OK")
</pallas_src>

<mosaic_0001>
module attributes {stable_mosaic.version = 11 : i64} {
  func.func @kernel(%arg0: i32, %arg1: memref<1x4x128xf32, #tpu.memory_space<vmem>>, %arg2: memref<8x4xf32, #tpu.memory_space<vmem>>, %arg3: memref<3x8x8xf32, #tpu.memory_space<vmem>>, %arg4: memref<8x2xf32, #tpu.memory_space<vmem>>, %arg5: memref<1x8x128xf32, #tpu.memory_space<vmem>>) attributes {dimension_semantics = [#tpu.dimension_semantics<parallel>], iteration_bounds = array<i64: 2>, scalar_prefetch = 0 : i64, scratch_operands = 0 : i64, tpu.core_type = #tpu.core_type<tc>, window_params = [{transform_indices = @transform_0, window_bounds = array<i64: 1, 4, 128>}, {pipeline_mode = #tpu.pipeline_mode<synchronous>, transform_indices = @transform_1, window_bounds = array<i64: 8, 4>}, {pipeline_mode = #tpu.pipeline_mode<synchronous>, transform_indices = @transform_2, window_bounds = array<i64: 3, 8, 8>}, {pipeline_mode = #tpu.pipeline_mode<synchronous>, transform_indices = @transform_3, window_bounds = array<i64: 8, 2>}, {transform_indices = @transform_4, window_bounds = array<i64: 1, 8, 128>}]} {
    %c0 = arith.constant 0 : index
    %c0_0 = arith.constant 0 : index
    %0 = vector.load %arg2[%c0, %c0_0] : memref<8x4xf32, #tpu.memory_space<vmem>>, vector<8x4xf32>
    %c0_1 = arith.constant 0 : index
    %c0_2 = arith.constant 0 : index
    %c0_3 = arith.constant 0 : index
    %1 = vector.load %arg3[%c0_1, %c0_2, %c0_3] : memref<3x8x8xf32, #tpu.memory_space<vmem>>, vector<1x8x8xf32>
    %2 = vector.shape_cast %1 : vector<1x8x8xf32> to vector<8x8xf32>
    %c1 = arith.constant 1 : index
    %c0_4 = arith.constant 0 : index
    %c0_5 = arith.constant 0 : index
    %3 = vector.load %arg3[%c1, %c0_4, %c0_5] : memref<3x8x8xf32, #tpu.memory_space<vmem>>, vector<1x8x8xf32>
    %4 = vector.shape_cast %3 : vector<1x8x8xf32> to vector<8x8xf32>
    %c2 = arith.constant 2 : index
    %c0_6 = arith.constant 0 : index
    %c0_7 = arith.constant 0 : index
    %5 = vector.load %arg3[%c2, %c0_6, %c0_7] : memref<3x8x8xf32, #tpu.memory_space<vmem>>, vector<1x8x8xf32>
    %6 = vector.shape_cast %5 : vector<1x8x8xf32> to vector<8x8xf32>
    %c0_8 = arith.constant 0 : index
    %c0_9 = arith.constant 0 : index
    %7 = vector.load %arg4[%c0_8, %c0_9] : memref<8x2xf32, #tpu.memory_space<vmem>>, vector<8x1xf32>
    %c0_10 = arith.constant 0 : index
    %c1_11 = arith.constant 1 : index
    %8 = vector.load %arg4[%c0_10, %c1_11] : memref<8x2xf32, #tpu.memory_space<vmem>>, vector<8x1xf32>
    %9 = tpu.iota {dimensions = array<i32: 1>} : vector<1x128xi32>
    %c0_i32 = arith.constant 0 : i32
    %10 = vector.broadcast %c0_i32 : i32 to vector<1x128xi32>
    %11 = arith.cmpi ne, %9, %10 : vector<1x128xi32>
    %12 = arith.extui %11 : vector<1x128xi1> to vector<1x128xi32>
    %13 = arith.sitofp %12 : vector<1x128xi32> to vector<1x128xf32>
    %c127_i32 = arith.constant 127 : i32
    %14 = vector.broadcast %c127_i32 : i32 to vector<1x128xi32>
    %15 = arith.cmpi ne, %9, %14 : vector<1x128xi32>
    %16 = arith.extui %15 : vector<1x128xi1> to vector<1x128xi32>
    %17 = arith.sitofp %16 : vector<1x128xi32> to vector<1x128xf32>
    %c0_12 = arith.constant 0 : index
    %c0_13 = arith.constant 0 : index
    %c0_14 = arith.constant 0 : index
    %18 = vector.load %arg1[%c0_12, %c0_13, %c0_14] : memref<1x4x128xf32, #tpu.memory_space<vmem>>, vector<1x4x128xf32>
    %19 = vector.shape_cast %18 : vector<1x4x128xf32> to vector<4x128xf32>
    %cst = arith.constant dense<0.000000e+00> : vector<8x128xf32>
    %20 = tpu.matmul %0, %19, %cst {dimension_numbers = #tpu.dot_dimension_numbers<[1], [0], [0], [1], [0, 0, 1, 1], [], []>} : vector<8x4xf32>, vector<4x128xf32>, vector<8x128xf32> -> vector<8x128xf32>
    %21 = vector.broadcast %7 : vector<8x1xf32> to vector<8x128xf32>
    %22 = arith.addf %20, %21 : vector<8x128xf32>
    %cst_15 = arith.constant 5.000000e-01 : f32
    %23 = vector.broadcast %cst_15 : f32 to vector<8x128xf32>
    %24 = arith.mulf %23, %22 : vector<8x128xf32>
    %cst_16 = arith.constant 0.707106769 : f32
    %25 = vector.broadcast %cst_16 : f32 to vector<8x128xf32>
    %26 = arith.mulf %22, %25 : vector<8x128xf32>
    %27 = math.erf %26 : vector<8x128xf32>
    %cst_17 = arith.constant 1.000000e+00 : f32
    %28 = vector.broadcast %cst_17 : f32 to vector<8x128xf32>
    %29 = arith.addf %28, %27 : vector<8x128xf32>
    %30 = arith.mulf %24, %29 : vector<8x128xf32>
    %c1_i32 = arith.constant 1 : i32
    %31 = tpu.dynamic_rotate %30 by %c1_i32 dim 1 : vector<8x128xf32>, i32 -> vector<8x128xf32>
    %32 = vector.broadcast %13 : vector<1x128xf32> to vector<8x128xf32>
    %33 = arith.mulf %31, %32 : vector<8x128xf32>
    %c127_i32_18 = arith.constant 127 : i32
    %34 = tpu.dynamic_rotate %30 by %c127_i32_18 dim 1 : vector<8x128xf32>, i32 -> vector<8x128xf32>
    %35 = vector.broadcast %17 : vector<1x128xf32> to vector<8x128xf32>
    %36 = arith.mulf %34, %35 : vector<8x128xf32>
    %cst_19 = arith.constant dense<0.000000e+00> : vector<8x128xf32>
    %37 = tpu.matmul %4, %30, %cst_19 {dimension_numbers = #tpu.dot_dimension_numbers<[1], [0], [0], [1], [0, 0, 1, 1], [], []>} : vector<8x8xf32>, vector<8x128xf32>, vector<8x128xf32> -> vector<8x128xf32>
    %cst_20 = arith.constant dense<0.000000e+00> : vector<8x128xf32>
    %38 = tpu.matmul %2, %33, %cst_20 {dimension_numbers = #tpu.dot_dimension_numbers<[1], [0], [0], [1], [0, 0, 1, 1], [], []>} : vector<8x8xf32>, vector<8x128xf32>, vector<8x128xf32> -> vector<8x128xf32>
    %39 = arith.addf %37, %38 : vector<8x128xf32>
    %cst_21 = arith.constant dense<0.000000e+00> : vector<8x128xf32>
    %40 = tpu.matmul %6, %36, %cst_21 {dimension_numbers = #tpu.dot_dimension_numbers<[1], [0], [0], [1], [0, 0, 1, 1], [], []>} : vector<8x8xf32>, vector<8x128xf32>, vector<8x128xf32> -> vector<8x128xf32>
    %41 = arith.addf %39, %40 : vector<8x128xf32>
    %42 = vector.broadcast %8 : vector<8x1xf32> to vector<8x128xf32>
    %43 = arith.addf %41, %42 : vector<8x128xf32>
    %cst_22 = arith.constant 5.000000e-01 : f32
    %44 = vector.broadcast %cst_22 : f32 to vector<8x128xf32>
    %45 = arith.mulf %44, %43 : vector<8x128xf32>
    %cst_23 = arith.constant 0.707106769 : f32
    %46 = vector.broadcast %cst_23 : f32 to vector<8x128xf32>
    %47 = arith.mulf %43, %46 : vector<8x128xf32>
    %48 = math.erf %47 : vector<8x128xf32>
    %cst_24 = arith.constant 1.000000e+00 : f32
    %49 = vector.broadcast %cst_24 : f32 to vector<8x128xf32>
    %50 = arith.addf %49, %48 : vector<8x128xf32>
    %51 = arith.mulf %45, %50 : vector<8x128xf32>
    %c0_25 = arith.constant 0 : index
    %c0_26 = arith.constant 0 : index
    %c0_27 = arith.constant 0 : index
    %52 = vector.load %arg5[%c0_25, %c0_26, %c0_27] : memref<1x8x128xf32, #tpu.memory_space<vmem>>, vector<1x8x128xf32>
    %53 = vector.shape_cast %52 : vector<1x8x128xf32> to vector<8x128xf32>
    %54 = vector.shape_cast %51 : vector<8x128xf32> to vector<1x8x128xf32>
    tpu.vector_store %arg5[%c0_25, %c0_26, %c0_27], %54 {strides = array<i32>} : memref<1x8x128xf32, #tpu.memory_space<vmem>>, vector<1x8x128xf32>,
    return
  }
  func.func @transform_0(%arg0: i32) -> (i32, i32, i32) {
    %c0_i32 = arith.constant 0 : i32
    %c0_i32_0 = arith.constant 0 : i32
    %c0_i32_1 = arith.constant 0 : i32
    return %arg0, %c0_i32, %c0_i32_0 : i32, i32, i32
  }
  func.func @transform_1(%arg0: i32) -> (i32, i32) {
    %c0_i32 = arith.constant 0 : i32
    %c0_i32_0 = arith.constant 0 : i32
    %c0_i32_1 = arith.constant 0 : i32
    return %c0_i32, %c0_i32_0 : i32, i32
  }
  func.func @transform_2(%arg0: i32) -> (i32, i32, i32) {
    %c0_i32 = arith.constant 0 : i32
    %c0_i32_0 = arith.constant 0 : i32
    %c0_i32_1 = arith.constant 0 : i32
    %c0_i32_2 = arith.constant 0 : i32
    return %c0_i32, %c0_i32_0, %c0_i32_1 : i32, i32, i32
  }
  func.func @transform_3(%arg0: i32) -> (i32, i32) {
    %c0_i32 = arith.constant 0 : i32
    %c0_i32_0 = arith.constant 0 : i32
    %c0_i32_1 = arith.constant 0 : i32
    return %c0_i32, %c0_i32_0 : i32, i32
  }
  func.func @transform_4(%arg0: i32) -> (i32, i32, i32) {
    %c0_i32 = arith.constant 0 : i32
    %c0_i32_0 = arith.constant 0 : i32
    %c0_i32_1 = arith.constant 0 : i32
    return %arg0, %c0_i32, %c0_i32_0 : i32, i32, i32
  }
}

</mosaic_0001>

<bundles_post_ra>
// kernel: tpu_custom_call.1
= control target key start
LH: loop header
LB: loop body
LE: loop exit
PB: predicated region body
PF: predicated region fallthrough
CT: control target
= control target key end

     0   :  { %9 = vsyncpa [#allocation3], 0  ;;  %s837_s0 = inlined_call_operand.vmem [shape: f32[2,4,128], index: 0, kind: input, shape index: {}]   ;;  %s838_s1 = inlined_call_operand.vmem [shape: f32[8,4], index: 1, kind: input, shape index: {}]   ;;  %s839_s2 = inlined_call_operand.hbm [shape: f32[3,8,8], index: 2, kind: input, shape index: {}]   ;;  %s840_s3 = inlined_call_operand.vmem [shape: f32[8,2], index: 3, kind: input, shape index: {}]   ;;  %s841_s4 = inlined_call_operand.hbm [shape: f32[2,8,128], index: 4, kind: output, shape index: {}]  }
   0x1   :  { %10 = vsyncpa [#allocation4], 0 }
   0x2   :  { %12 = vsyncpa [#allocation4 + $0x1], 0  ;;  %s733_s15 = smov 0   ;;  %s735_s16 = smov 0  }
   0x3   :  { %s737_s17 = smov 0   ;;  %s739_s18 = smov 0  }
   0x4 LB: > { %s754_s19 = sadd.s32 4294967295, %s698_s18   ;;  %s517_s20 = sadd.s32 4294967294, %s698_s18   ;;  %s698_s18 = sphi %s739_s18, %s847_s18   ;;  %s694_s17 = sphi %s737_s17, %s846_s17   ;;  %s690_s16 = sphi %s735_s16, %s845_s16   ;;  %s686_s15 = sphi %s733_s15, %s844_s15  }
   0x5   : > { %s758_s21 = sadd.s32 1, %s698_s18   ;;  %s114_s22 = sadd.s32 1, %s694_s17 }
   0x6   : > { %s111_s23 = ssub.s32 %s698_s18, %s758_s21  ;;  %p124_p0 = scmp.ne.s32.totalorder %s694_s17, %s690_s16 }
   0x7   : > { %p112_p1 = scmp.eq.s32.totalorder %s111_s23, 0  ;;  %p125_p2 = scmp.eq.s32.totalorder %s754_s19, 1 }
   0x8   : > { %p130_p3 = scmp.ne.s32.totalorder %s690_s16, %s686_s15  ;;  %p131_p4 = scmp.eq.s32.totalorder %s517_s20, 1 }
   0x9   : > { %s769_s24 = scalar_select %p112_p1, %s694_s17, %s114_s22  }
   0xa   : > { %p771_p5 = por %p125_p2, %p124_p0  ;;  %p775_p6 = por %p131_p4, %p130_p3 }
   0xb   : > { %p518_p7 = scmp.ge.s32.totalorder %s698_s18, 1  ;;  %p138_p8 = scmp.lt.s32.totalorder %s698_s18, 3 }
   0xc   : > { %p552_p9 = scmp.eq.s32.totalorder %s754_s19, 0  ;;  %s152_s29 = sshll.u32 %s839_s2, 4  ;;  %s153_s29 = int_to_ptr.hbm [resolvable:$true] %s152_s29 }
   0xd   : > { %p139_p10 = pnand %p518_p7, %p138_p8  ;;  %s700_s30 = smov [#allocation2]  }
   0xe   : > { %s154_s5 = sshll.u32 %s700_s30, 4  ;;  %s701_s6 = smov 128   ;;  %s155_s5 = int_to_ptr.vmem [resolvable:$true] %s154_s5 }
   0xf   : > { %p544_p11 = pneg %p139_p10  ;;  %s702_s7 = smov 8  }
  0x10   : > { %180 = sbr.rel (%p139_p10) target bundleno = 517 (0x205), region = 36 }
  0x11   : > { %p545_p12 = pnand %p552_p9, %p544_p11 }
  0x13   : > { %547 = dma.hbm_to_vmem [thread:$0]  (!%p545_p12), %s153_s29, 384, %s155_s5, [#allocation3], %s701_s6, %s701_s6, %s702_s7  }
  0x15   : > { %677 = dma.done.wait (%p552_p9), [#allocation3], 384  }
  0x16   : > { %679 = vsyncadd (%p552_p9), [#allocation3], 4294966912  ;;  %p206_p13 = scmp.lt.s32.totalorder %s754_s19, 1  ;;  %v703_v0 = vmov 0   ;;  %vm235_vm0 = vcmask 1043456   ;;  %vm231_vm1 = vcmask 31744   ;;  %v217_v48 = vlaneseq }
  0x17   : > { %595 = vset.pattern.permute.xlu0 %v703_v0  ;;  %v210_v2 = vld [vmem:[%s838_s1] sm:$0xff]  ;;  %s704_s23 = smov 1   ;;  %s705_s27 = smov 127   ;;  %v213_v46 = vld [vmem:[#allocation2 + $0x8] sm:$0xff]  ;;  %vm309_vm6 = vcmask 64512   ;;  %v706_v47 = vmov 1  }
  0x18   : > { %s207_s8 = scalar_select %p206_p13, %s754_s19, 1  ;;  %v216_v3 = vld [vmem:[%s840_s3] sm:$0xff]  ;;  %596 = vset.pattern.permute.xlu1 %v706_v47  ;;  %v218_v49 = vand.u32 127, %v217_v48  ;;  %v707_v50 = vmov 0.0   ;;  %v215_v57 = vld [vmem:[#allocation2 + $0x10] sm:$0xff] }
  0x19   : > { %228 = vperm.xlu0 %595, %v216_v3   ;;  %v211_v58 = vld [vmem:[#allocation2] sm:$0xff]  ;;  %s203_s28 = sand.u32 1, %s690_s16   ;;  %s535_s30 = sshll.u32 %s754_s19, 3 }
  0x1a   : > { %s524_s9 = sshll.u32 %s207_s8, 2  ;;  %vm219_vm7 = vcmp.ne.s32.totalorder %v218_v49, 0  ;;  %vm222_vm8 = vcmp.ne.s32.totalorder %v218_v49, 127  ;;  %s523_s29 = sshll.u32 %s203_s28, 3 }
  0x1b   : > { %s209_s12 = scalar_lea.vmem %s837_s0, %s524_s9  ;;  %v525_v51 = vsel %vm219_vm7, 1.0, %v707_v50  ;;  %v526_v52 = vsel %vm222_vm8, 1.0, %v707_v50  ;;  %s441_s7 = scalar_lea.hbm %s841_s4, %s535_s30 }
  0x1c   : > { %v225_v1 = vld [vmem:[%s209_s12] sm:$0xf]  ;;  %s205_s8 = scalar_lea.vmem [#allocation5], %s523_s29  ;;  %s445_s10 = sshll.u32 %s441_s7, 4  ;;  %s446_s10 = int_to_ptr.hbm [resolvable:$true] %s445_s10 }
  0x1d   : > { %527 = vmatpush.msk.msra.mxu0 %vm235_vm0, %v225_v1  ;;  %s443_s9 = sshll.u32 %s205_s8, 4  ;;  %s431_s19 = scalar_lea.sflag [#allocation4], %s203_s28  ;;  %s444_s9 = int_to_ptr.vmem [resolvable:$true] %s443_s9 }
  0x1e   : > { %528 = vmatmul.msk.f32.vlgmr.msra.gmra.mxu0 %vm231_vm1, %v210_v2  ;;  %s646_s11 = sshra.s32 %s446_s10, 4  ;;  %s652_s20 = scalar_lea.hbm %s841_s4, 16  ;;  %s647_s11 = int_to_ptr.hbm [resolvable:$true] %s646_s11 }
  0x1f   : > { %s648_s12 = scalar_lea.hbm %s647_s11, 8  ;;  %p653_p3 = scmp.lt.s32.totalorder %s647_s11, %s841_s4 }
  0x20   : > { %p649_p0 = scmp.ne.s32.totalorder %s647_s11, %s648_s12  ;;  %p654_p4 = scmp.lt.s32.totalorder %s652_s20, %s648_s12 }
  0x21   : > { %597 = vset.pattern.permute.xlu0 %v706_v47 }
  0x22   : > { %p650_p1 = pnand %p649_p0, %p771_p5  ;;  %p655_p7 = por %p654_p4, %p653_p3 }
  0x24   : > { %p651_p2 = pneg %p650_p1 }
  0x26   : > { %p656_p8 = pnand %p655_p7, %p651_p2 }
  0x8b   : > { %v229_v4 = vpop.permute.xlu0 %228 }
  0x9b   : > { %v256_v5 = vpop.f32.mrf.mxu0 }
  0x9c   : > { %v257_v6 = vadd.f32 %v256_v5, %v229_v4 }
  0x9e   : > { %v260_v7 = vmul.f32 0.70710677, %v257_v6  ;;  %v259_v43 = vmul.f32 0.5, %v257_v6 }
  0xa0   : > { %v261_v8 = vmul.f32 %v260_v7, %v260_v7 }
  0xa2   : > { %v262_v9 = vmin.f32 %v261_v8, 16.0 }
  0xa4   : > { %v263_v10 = vmul.f32 2.1237322e-06, %v262_v9  ;;  %v274_v11 = vmul.f32 3.8918573e-05, %v262_v9 }
  0xa6   : > { %v264_v12 = vadd.f32 0.00028619796, %v263_v10  ;;  %v275_v13 = vadd.f32 0.001143296, %v274_v11 }
  0xa8   : > { %v265_v14 = vmul.f32 %v264_v12, %v262_v9  ;;  %v276_v15 = vmul.f32 %v275_v13, %v262_v9 }
  0xaa   : > { %v277_v16 = vadd.f32 0.014752088, %v276_v15  ;;  %v266_v17 = vadd.f32 0.0036580483, %v265_v14 }
  0xac   : > { %v278_v18 = vmul.f32 %v277_v16, %v262_v9  ;;  %v267_v20 = vmul.f32 %v266_v17, %v262_v9 }
  0xae   : > { %v279_v19 = vadd.f32 0.112945676, %v278_v18  ;;  %v268_v23 = vadd.f32 0.05243302, %v267_v20 }
  0xb0   : > { %v280_v21 = vmul.f32 %v279_v19, %v262_v9  ;;  %v269_v26 = vmul.f32 %v268_v23, %v262_v9 }
  0xb2   : > { %v281_v22 = vadd.f32 0.4994258, %v280_v21  ;;  %v270_v27 = vadd.f32 0.18741608, %v269_v26 }
  0xb4   : > { %v282_v24 = vmul.f32 %v281_v22, %v262_v9  ;;  %v271_v29 = vmul.f32 %v270_v27, %v262_v9 }
  0xb6   : > { %v283_v25 = vadd.f32 1.0, %v282_v24  ;;  %v272_v33 = vadd.f32 1.1283791, %v271_v29 }
  0xb8   : > { %598 = vrcp.f32 %v283_v25  ;;  %v295_v32 = vand.u32 2147483648, %v283_v25  ;;  %v293_v35 = vand.u32 2147483647, %v283_v25  ;;  %vm289_vm3 = vweird.f32 %v283_v25 }
  0xb9   : > { %v273_v38 = vmul.f32 %v272_v33, %v260_v7 }
  0xba   : > { %v296_v37 = vor.u32 1.1754944e-38, %v295_v32  ;;  %vm294_vm5 = vcmp.eq.f32.partialorder %v293_v35, 8.507059e+37 }
  0xbe   : > { %v599_v28 = vpop.eup %598 }
  0xbf   : > { %v285_v30 = vmul.f32 %v599_v28, %v283_v25  ;;  %vm290_vm2 = vweird.f32 %v599_v28 }
  0xc0   : > { %vm291_vm4 = vmor %vm289_vm3, %vm290_vm2 }
  0xc1   : > { %v286_v31 = vsub.f32 1.0, %v285_v30 }
  0xc3   : > { %v287_v34 = vmul.f32 %v599_v28, %v286_v31 }
  0xc5   : > { %v288_v36 = vadd.f32 %v599_v28, %v287_v34 }
  0xc7   : > { %v292_v39 = vsel %vm291_vm4, %v599_v28, %v288_v36 }
  0xc8   : > { %v297_v40 = vsel %vm294_vm5, %v296_v37, %v292_v39 }
  0xc9   : > { %v298_v41 = vmul.f32 %v297_v40, %v273_v38 }
  0xcb   : > { %v529_v42 = vclamps-f32 %v298_v41, 1.0 }
  0xcd   : > { %v301_v44 = vadd.f32 1.0, %v529_v42 }
  0xcf   : > { %v302_v45 = vmul.f32 %v301_v44, %v259_v43 }
  0xd1   : > { %303 = vrot.lane.b32.xlu1 %v302_v45, %s704_s23  ;;  %306 = vrot.lane.b32.xlu0 %v302_v45, %s705_s27 }
  0xd2   : > { %351 = vmatpush.msra.mxu2 %v302_v45 }
  0xd3   : > { %531 = vmatmul.msk.f32.vlgmr.msra.gmra.mxu2 %vm309_vm6, %v213_v46 }
  0xd9   : > { %381 = vperm.xlu1 %596, %v216_v3  }
 0x143   : > { %v304_v53 = vpop.permute.xlu1 %303  ;;  %v307_v54 = vpop.permute.xlu0 %306 }
 0x144   : > { %v305_v55 = vmul.f32 %v525_v51, %v304_v53  ;;  %v308_v56 = vmul.f32 %v526_v52, %v307_v54 }
 0x146   : > { %328 = vmatpush.msra.mxu1 %v305_v55  ;;  %374 = vmatpush.msra.mxu3 %v308_v56 }
 0x147   : > { %532 = vmatmul.msk.f32.vlgmr.msra.gmra.mxu3 %vm309_vm6, %v215_v57  ;;  %530 = vmatmul.msk.f32.vlgmr.msra.gmra.mxu1 %vm309_vm6, %v211_v58 }
 0x14b   : > { %v382_v63 = vpop.permute.xlu1 %381 }
 0x156   : > { %v353_v60 = vpop.f32.mrf.mxu2 }
 0x1c4   : > { %v330_v59 = vpop.f32.mrf.mxu1 }
 0x1c5   : > { %v354_v61 = vadd.f32 %v353_v60, %v330_v59 }
 0x1ca   : > { %v376_v62 = vpop.f32.mrf.mxu3 }
 0x1cb   : > { %v379_v0 = vadd.f32 %v376_v62, %v354_v61 }
 0x1cd   : > { %v384_v1 = vadd.f32 %v382_v63, %v379_v0 }
 0x1cf   : > { %v386_v2 = vmul.f32 0.70710677, %v384_v1  ;;  %v385_v38 = vmul.f32 0.5, %v384_v1 }
 0x1d1   : > { %v387_v3 = vmul.f32 %v386_v2, %v386_v2 }
 0x1d3   : > { %v388_v4 = vmin.f32 %v387_v3, 16.0 }
 0x1d5   : > { %v389_v5 = vmul.f32 2.1237322e-06, %v388_v4  ;;  %v400_v6 = vmul.f32 3.8918573e-05, %v388_v4 }
 0x1d7   : > { %v390_v7 = vadd.f32 0.00028619796, %v389_v5  ;;  %v401_v8 = vadd.f32 0.001143296, %v400_v6 }
 0x1d9   : > { %v391_v9 = vmul.f32 %v390_v7, %v388_v4  ;;  %v402_v10 = vmul.f32 %v401_v8, %v388_v4 }
 0x1db   : > { %v403_v11 = vadd.f32 0.014752088, %v402_v10  ;;  %v392_v12 = vadd.f32 0.0036580483, %v391_v9 }
 0x1dd   : > { %v404_v13 = vmul.f32 %v403_v11, %v388_v4  ;;  %v393_v15 = vmul.f32 %v392_v12, %v388_v4 }
 0x1df   : > { %v405_v14 = vadd.f32 0.112945676, %v404_v13  ;;  %v394_v18 = vadd.f32 0.05243302, %v393_v15 }
 0x1e1   : > { %v406_v16 = vmul.f32 %v405_v14, %v388_v4  ;;  %v395_v21 = vmul.f32 %v394_v18, %v388_v4 }
 0x1e3   : > { %v407_v17 = vadd.f32 0.4994258, %v406_v16  ;;  %v396_v22 = vadd.f32 0.18741608, %v395_v21 }
 0x1e5   : > { %v408_v19 = vmul.f32 %v407_v17, %v388_v4  ;;  %v397_v24 = vmul.f32 %v396_v22, %v388_v4 }
 0x1e7   : > { %v409_v20 = vadd.f32 1.0, %v408_v19  ;;  %v398_v28 = vadd.f32 1.1283791, %v397_v24 }
 0x1e9   : > { %600 = vrcp.f32 %v409_v20  ;;  %v421_v27 = vand.u32 2147483648, %v409_v20  ;;  %v419_v30 = vand.u32 2147483647, %v409_v20  ;;  %vm415_vm10 = vweird.f32 %v409_v20 }
 0x1ea   : > { %v399_v33 = vmul.f32 %v398_v28, %v386_v2 }
 0x1eb   : > { %v422_v32 = vor.u32 1.1754944e-38, %v421_v27  ;;  %vm420_vm12 = vcmp.eq.f32.partialorder %v419_v30, 8.507059e+37 }
 0x1ef   : > { %v601_v23 = vpop.eup %600 }
 0x1f0   : > { %v411_v25 = vmul.f32 %v601_v23, %v409_v20  ;;  %vm416_vm9 = vweird.f32 %v601_v23 }
 0x1f1   : > { %vm417_vm11 = vmor %vm415_vm10, %vm416_vm9 }
 0x1f2   : > { %v412_v26 = vsub.f32 1.0, %v411_v25 }
 0x1f4   : > { %v413_v29 = vmul.f32 %v601_v23, %v412_v26 }
 0x1f6   : > { %v414_v31 = vadd.f32 %v601_v23, %v413_v29 }
 0x1f8   : > { %v418_v34 = vsel %vm417_vm11, %v601_v23, %v414_v31 }
 0x1f9   : > { %v423_v35 = vsel %vm420_vm12, %v422_v32, %v418_v34 }
 0x1fa   : > { %v424_v36 = vmul.f32 %v423_v35, %v399_v33 }
 0x1fc   : > { %v533_v37 = vclamps-f32 %v424_v36, 1.0 }
 0x1fe   : > { %v427_v39 = vadd.f32 1.0, %v533_v37 }
 0x200   : > { %v428_v40 = vmul.f32 %v427_v39, %v385_v38 }
 0x202   : > { %429 = vst [vmem:[%s205_s8] sm:$0xff] %v428_v40 }
 0x203   : > { %659 = shalt.err (!%p656_p8)
}
 0x204   : > { %542 = dma.vmem_to_hbm [thread:$0]  (%p771_p5), %s444_s9, 128, %s446_s10, %s431_s19  }
 0x205 PF: > { %p554_p9 = scmp.ge.s32.totalorder %s698_s18, 2  ;;  %s457_s27 = sand.u32 1, %s686_s15  }
 0x206   : > { %s458_s28 = scalar_lea.sflag [#allocation4], %s457_s27 }
 0x207   : > { %p549_p10 = pnand %p554_p9, %p775_p6 }
 0x209   : > { %p550_p11 = pneg %p549_p10 }
 0x20b   : > { %681 = dma.done.wait (%p550_p11), %s458_s28, 128  }
 0x20c   : > { %683 = vsyncadd (%p550_p11), %s458_s28, 4294967168  ;;  %p15_p12 = scmp.ge.s32.totalorder %s758_s21, 4   ;;  %s844_s15 = smov %s690_s16 }
 0x20d   : > { %s845_s16 = smov %s694_s17  ;;  %s846_s17 = smov %s769_s24 }
 0x20e   : > { %s847_s18 = smov %s758_s21  ;;  %17 = sbr.rel (!%p15_p12) target bundleno = 4 (0x4), region = 78 }
 0x213   :  { %464 = vsyncpa [#allocation3], 1 }
 0x214   :  { %466 = vsyncpa [#allocation3 + $0x1], 1 }
 0x215   :  { %467 = vsyncpa [#allocation4], 1 }
 0x216   :  { %469 = vsyncpa [#allocation4 + $0x1], 1 }

</bundles_post_ra>
